<compile_context>
chip_gen: v7x
topology: tpu7x:2x2x1
jax: 0.10.0
libtpu: 0.0.40
codegen_flags: <defaults>
</compile_context>

<pallas_src>
import jax
import jax.numpy as jnp
from jax.experimental import pallas as pl
from jax.experimental.pallas import tpu as pltpu


def _device_kind():
    try:
        return jax.devices()[0].device_kind.lower()
    except Exception:
        return ""


def _is_v7(kind):
    return "v7" in kind


def _has_bf16_vpu(kind):
    # v2-v5 have no bf16 VALU worth using; keep elementwise math in f32 there.
    return not any(v in kind for v in ("v2", "v3", "v4", "v5"))


def _make_kernel(compute_dtype):
    def kernel(x_ref, scale_ref, bias_ref, w_ref, o_ref):
        # x_ref:     (1, TH, Wo, 2*Cp)   bf16 strip, W column pairs folded into lanes
        # scale_ref: (1, 2*Cp)           folded BN scale, duplicated per half
        # bias_ref:  (1, 2*Cp)           folded BN bias, duplicated per half
        # w_ref:     (Cp, Kp)            bf16 1x1-conv weight, pre-scaled by 0.25
        # o_ref:     (1, TH//2, Wo, Kp)  bf16 output strip
        _, TH, Wo, Cp2 = x_ref.shape
        Cp = Cp2 // 2
        TH2 = TH // 2
        Kp = w_ref.shape[1]

        x = x_ref[0].astype(compute_dtype)             # (TH, Wo, 2Cp)
        scale = scale_ref[...].astype(compute_dtype)   # (1, 2Cp), broadcast once
        bias = bias_ref[...].astype(compute_dtype)

        # BN (inference, folded) + ReLU on every pixel; single broadcasted FMA.
        h = jnp.maximum(x * scale + bias, 0)           # (TH, Wo, 2Cp)

        # 2x2 average pool (the 1/4 is folded into the conv weight):
        #  * W-pair: 128-aligned lane slice + add (pure VPU, no relayout).
        #  * H-pair: leading-dim split + add (vreg adds, no relayout).
        hw = h[..., :Cp] + h[..., Cp:]                 # (TH, Wo, Cp)
        hp = hw.reshape(TH2, 2, Wo, Cp).sum(axis=1)    # (TH2, Wo, Cp)

        # 1x1 conv == channel matmul on the *pooled* activations (4x fewer MXU
        # FLOPs than conv-then-pool).  bf16 operands, f32 accumulation.
        a = hp.reshape(TH2 * Wo, Cp).astype(jnp.bfloat16)
        y = jnp.dot(a, w_ref[...], preferred_element_type=jnp.float32)
        o_ref[0] = y.reshape(TH2, Wo, Kp).astype(o_ref.dtype)

    return kernel


def _pick_tile_rows(H, Wo, Cp, Kp, ew_bytes, out_bytes, budget_bytes):
    """Largest even divisor of H whose whole per-step VMEM footprint fits."""
    Cp2 = 2 * Cp

    def footprint(th):
        th2 = th // 2
        in_buf = 2 * th * Wo * Cp2 * 2            # double-buffered bf16 input strip
        out_buf = 2 * th2 * Wo * Kp * out_bytes   # double-buffered output block
        w_buf = 2 * Cp * Kp * 2                   # weight is double-buffered too
        temps = 3 * th * Wo * Cp2 * ew_bytes      # h / hw / hp + matmul operand
        return in_buf + out_buf + w_buf + temps

    th = H - (H % 2)
    while th > 2 and (H % th != 0 or footprint(th) > budget_bytes):
        th -= 2
    return max(th, 2)


def transition_block_forward_nhwc(x_nhwc, gamma, beta, running_mean, running_var,
                                  conv_w, eps=1e-5, drop_rate=0.0, tile_rows=None,
                                  out_dtype=jnp.bfloat16, compute_dtype=None):
    """Eval-mode TransitionBlock forward, channels-last in / channels-last out.

    Preferred entry point: the kernel is HBM-bound, so avoiding the two
    full-tensor NCHW<->NHWC transposes is the largest end-to-end win.
    Returns (N, H//2, W//2, K) in `out_dtype` (bf16 by default to halve the
    output HBM write traffic).
    """
    # TODO(synk): training-mode dropout (drop_rate > 0) and BatchNorm batch-stat
    # updates are not implemented; this is the eval/inference forward pass.
    assert drop_rate == 0.0, "dropout path not implemented"
    N, H, W, C = x_nhwc.shape
    K = conv_w.shape[0]                       # out channels = int(C * compression)
    # TODO(synk): odd spatial dims (avg_pool2d drops the trailing row/col).
    assert H % 2 == 0 and W % 2 == 0

    kind = _device_kind()
    if compute_dtype is None:
        compute_dtype = jnp.bfloat16 if _has_bf16_vpu(kind) else jnp.float32

    Cp = ((C + 127) // 128) * 128
    Kp = ((K + 127) // 128) * 128
    Ho, Wo = H // 2, W // 2

    # Pad channels to 128 lanes (no-op for typical DenseNet transition widths),
    # then view each W column pair along the lane dim:
    # (N, H, W, Cp) -> (N, H, Wo, 2*Cp).  Pure view in HBM (same flat layout).
    x_pad = jnp.pad(x_nhwc.astype(jnp.bfloat16),
                    ((0, 0), (0, 0), (0, 0), (0, Cp - C)))
    x_pair = x_pad.reshape(N, H, Wo, 2 * Cp)

    # Fold BN running stats into per-channel scale/bias (zero on padded lanes),
    # duplicated across the two column-pair halves of the lane dim.
    scale = (gamma / jnp.sqrt(running_var + eps)).astype(jnp.float32)
    bias = (beta - running_mean * scale).astype(jnp.float32)
    scale2 = jnp.tile(jnp.pad(scale, (0, Cp - C)), 2).reshape(1, 2 * Cp)
    bias2 = jnp.tile(jnp.pad(bias, (0, Cp - C)), 2).reshape(1, 2 * Cp)
    scale2 = scale2.astype(compute_dtype)
    bias2 = bias2.astype(compute_dtype)

    # Conv weight (K, C, 1, 1) -> matmul operand (Cp, Kp), with the 2x2
    # average-pool's 1/4 folded in (pool commutes with the linear 1x1 conv).
    w_mat = jnp.transpose(conv_w[:, :, 0, 0], (1, 0)) * 0.25            # (C, K)
    w_pad = jnp.pad(w_mat, ((0, Cp - C), (0, Kp - K))).astype(jnp.bfloat16)

    out_bytes = jnp.dtype(out_dtype).itemsize
    ew_bytes = jnp.dtype(compute_dtype).itemsize
    # VMEM: v7x has 64 MiB physical / 32 MiB scoped; v5e/v6e have 128 MiB.
    if _is_v7(kind):
        budget, vmem_limit = 24 * 1024 * 1024, 32 * 1024 * 1024
    else:
        budget, vmem_limit = 72 * 1024 * 1024, 100 * 1024 * 1024

    th = tile_rows if tile_rows is not None else _pick_tile_rows(
        H, Wo, Cp, Kp, ew_bytes, out_bytes, budget)
    assert th % 2 == 0 and H % th == 0, (th, H)
    th2 = th // 2
    grid = (N, H // th)
    # TODO(synk): if Wo % 8 != 0 or (th2 * Wo) < 128, pad W / bias the tile so
    # the pre-matmul reshape stays layout-free and the MXU M-dim is filled.

    # Advisory scheduler hint (padded Cp/Kp; weight counted once).
    flops = 2 * N * Ho * Wo * Cp * Kp + 5 * N * H * Wo * 2 * Cp
    bytes_accessed = (x_pair.size * 2 + w_pad.size * 2
                      + (scale2.size + bias2.size) * ew_bytes
                      + N * Ho * Wo * Kp * out_bytes)

    out_pad = pl.pallas_call(
        _make_kernel(compute_dtype),
        out_shape=jax.ShapeDtypeStruct((N, Ho, Wo, Kp), out_dtype),
        grid_spec=pltpu.PrefetchScalarGridSpec(
            num_scalar_prefetch=0,
            grid=grid,
            in_specs=[
                pl.BlockSpec((1, th, Wo, 2 * Cp), lambda n, t: (n, t, 0, 0)),
                pl.BlockSpec((1, 2 * Cp), lambda n, t: (0, 0)),
                pl.BlockSpec((1, 2 * Cp), lambda n, t: (0, 0)),
                pl.BlockSpec((Cp, Kp), lambda n, t: (0, 0)),
            ],
            out_specs=pl.BlockSpec((1, th2, Wo, Kp), lambda n, t: (n, t, 0, 0)),
        ),
        compiler_params=pltpu.CompilerParams(
            dimension_semantics=("parallel", "parallel"),
            vmem_limit_bytes=vmem_limit,
        ),
        cost_estimate=pl.CostEstimate(
            flops=int(flops), transcendentals=0,
            bytes_accessed=int(bytes_accessed)),
    )(x_pair, scale2, bias2, w_pad)

    # Drop channel padding (no-op when K % 128 == 0); output stays NHWC.
    return out_pad[:, :, :, :K]


def transition_block_forward(x_nchw, gamma, beta, running_mean, running_var,
                             conv_w, eps=1e-5, drop_rate=0.0, tile_rows=None,
                             out_dtype=jnp.bfloat16, compute_dtype=None):
    """NCHW-in / NCHW-out convenience wrapper matching the PyTorch module.

    The two full-tensor transposes here roughly double end-to-end HBM traffic
    of this mem-bound op; channels-last callers should use
    `transition_block_forward_nhwc` directly.
    """
    x_nhwc = jnp.transpose(x_nchw, (0, 2, 3, 1))
    out_nhwc = transition_block_forward_nhwc(
        x_nhwc, gamma, beta, running_mean, running_var, conv_w, eps=eps,
        drop_rate=drop_rate, tile_rows=tile_rows, out_dtype=out_dtype,
        compute_dtype=compute_dtype)
    return jnp.transpose(out_nhwc, (0, 3, 1, 2))


def _reference_forward(x, gamma, beta, mean, var, conv_w, eps=1e-5):
    """Pure-JAX reference (matches PyTorch eval-mode forward)."""
    xn = (x - mean[None, :, None, None]) / jnp.sqrt(var + eps)[None, :, None, None]
    xn = xn * gamma[None, :, None, None] + beta[None, :, None, None]
    xn = jnp.maximum(xn, 0.0)
    y = jnp.einsum('nchw,kc->nkhw', xn, conv_w[:, :, 0, 0])   # 1x1 conv, no bias
    N, K, H, W = y.shape
    return y.reshape(N, K, H // 2, 2, W // 2, 2).mean(axis=(3, 5))


if __name__ == "__main__":
    # Module config: TransitionBlock(in_channel=4, compression_rate=1.0, drop_rate=0.0)
    N, C, H, W = 2, 4, 16, 16
    K = int(C * 1.0)

    key = jax.random.PRNGKey(0)
    kx, kg, kb, km, kv, kw = jax.random.split(key, 6)

    x = jax.random.normal(kx, (N, C, H, W), dtype=jnp.float32)
    gamma = 1.0 + 0.1 * jax.random.normal(kg, (C,), dtype=jnp.float32)
    beta = 0.1 * jax.random.normal(kb, (C,), dtype=jnp.float32)
    running_mean = 0.1 * jax.random.normal(km, (C,), dtype=jnp.float32)
    running_var = jnp.abs(1.0 + 0.1 * jax.random.normal(kv, (C,), dtype=jnp.float32))
    conv_w = jax.random.normal(kw, (K, C, 1, 1), dtype=jnp.float32) * (1.0 / jnp.sqrt(C))

    out = transition_block_forward(x, gamma, beta, running_mean, running_var, conv_w)
    out = jax.block_until_ready(out)

    ref = _reference_forward(x, gamma, beta, running_mean, running_var, conv_w)
    assert out.shape == (N, K, H // 2, W // 2), out.shape
    # bf16 activations / weights / output -> loose tolerance vs the f32 reference.
    err = float(jnp.max(jnp.abs(out.astype(jnp.float32) - ref)))
    assert jnp.allclose(out.astype(jnp.float32), ref, rtol=3e-2, atol=3e-2), err

    print("KERNEL_OK")
</pallas_src>

<mosaic_0001>
module attributes {stable_mosaic.version = 11 : i64} {
  func.func @kernel(%arg0: i32, %arg1: i32, %arg2: memref<1x16x8x256xbf16, #tpu.memory_space<vmem>>, %arg3: memref<1x256xbf16, #tpu.memory_space<vmem>>, %arg4: memref<1x256xbf16, #tpu.memory_space<vmem>>, %arg5: memref<128x128xbf16, #tpu.memory_space<vmem>>, %arg6: memref<1x8x8x128xbf16, #tpu.memory_space<vmem>>) attributes {dimension_semantics = [#tpu.dimension_semantics<parallel>, #tpu.dimension_semantics<parallel>], iteration_bounds = array<i64: 2, 1>, scalar_prefetch = 0 : i64, scratch_operands = 0 : i64, tpu.core_type = #tpu.core_type<tc>, window_params = [{transform_indices = @transform_0, window_bounds = array<i64: 1, 16, 8, 256>}, {pipeline_mode = #tpu.pipeline_mode<synchronous>, transform_indices = @transform_1, window_bounds = array<i64: 1, 256>}, {pipeline_mode = #tpu.pipeline_mode<synchronous>, transform_indices = @transform_2, window_bounds = array<i64: 1, 256>}, {pipeline_mode = #tpu.pipeline_mode<synchronous>, transform_indices = @transform_3, window_bounds = array<i64: 128, 128>}, {transform_indices = @transform_4, window_bounds = array<i64: 1, 8, 8, 128>}]} {
    %c0 = arith.constant 0 : index
    %c0_0 = arith.constant 0 : index
    %c0_1 = arith.constant 0 : index
    %c0_2 = arith.constant 0 : index
    %0 = vector.load %arg2[%c0, %c0_0, %c0_1, %c0_2] : memref<1x16x8x256xbf16, #tpu.memory_space<vmem>>, vector<1x16x8x256xbf16>
    %1 = vector.shape_cast %0 : vector<1x16x8x256xbf16> to vector<16x8x256xbf16>
    %c0_3 = arith.constant 0 : index
    %c0_4 = arith.constant 0 : index
    %2 = vector.load %arg3[%c0_3, %c0_4] : memref<1x256xbf16, #tpu.memory_space<vmem>>, vector<1x256xbf16>
    %c0_5 = arith.constant 0 : index
    %c0_6 = arith.constant 0 : index
    %3 = vector.load %arg4[%c0_5, %c0_6] : memref<1x256xbf16, #tpu.memory_space<vmem>>, vector<1x256xbf16>
    %4 = vector.shape_cast %2 : vector<1x256xbf16> to vector<1x1x256xbf16>
    %5 = vector.broadcast %4 : vector<1x1x256xbf16> to vector<16x8x256xbf16>
    %6 = arith.mulf %1, %5 : vector<16x8x256xbf16>
    %7 = vector.shape_cast %3 : vector<1x256xbf16> to vector<1x1x256xbf16>
    %8 = vector.broadcast %7 : vector<1x1x256xbf16> to vector<16x8x256xbf16>
    %9 = arith.addf %6, %8 : vector<16x8x256xbf16>
    %cst = arith.constant 0.000000e+00 : bf16
    %10 = vector.broadcast %cst : bf16 to vector<16x8x256xbf16>
    %11 = arith.maximumf %9, %10 : vector<16x8x256xbf16>
    %12 = vector.extract_strided_slice %11 {offsets = [0, 0, 0], sizes = [16, 8, 128], strides = [1, 1, 1]} : vector<16x8x256xbf16> to vector<16x8x128xbf16>
    %13 = vector.extract_strided_slice %11 {offsets = [0, 0, 128], sizes = [16, 8, 128], strides = [1, 1, 1]} : vector<16x8x256xbf16> to vector<16x8x128xbf16>
    %14 = arith.addf %12, %13 : vector<16x8x128xbf16>
    %15 = vector.shape_cast %14 : vector<16x8x128xbf16> to vector<8x2x8x128xbf16>
    %16 = arith.extf %15 : vector<8x2x8x128xbf16> to vector<8x2x8x128xf32>
    %cst_7 = arith.constant dense<0.000000e+00> : vector<8x8x128xf32>
    %17 = vector.multi_reduction <add>, %16, %cst_7 [1] : vector<8x2x8x128xf32> to vector<8x8x128xf32>
    %18 = arith.truncf %17 : vector<8x8x128xf32> to vector<8x8x128xbf16>
    %19 = vector.shape_cast %18 : vector<8x8x128xbf16> to vector<64x128xbf16>
    %c0_8 = arith.constant 0 : index
    %c0_9 = arith.constant 0 : index
    %20 = vector.load %arg5[%c0_8, %c0_9] : memref<128x128xbf16, #tpu.memory_space<vmem>>, vector<128x128xbf16>
    %cst_10 = arith.constant dense<0.000000e+00> : vector<64x128xf32>
    %21 = tpu.matmul %19, %20, %cst_10 {dimension_numbers = #tpu.dot_dimension_numbers<[1], [0], [0], [1], [0, 0, 1, 1], [], []>} : vector<64x128xbf16>, vector<128x128xbf16>, vector<64x128xf32> -> vector<64x128xf32>
    %22 = vector.shape_cast %21 : vector<64x128xf32> to vector<8x8x128xf32>
    %23 = arith.truncf %22 : vector<8x8x128xf32> to vector<8x8x128xbf16>
    %c0_11 = arith.constant 0 : index
    %c0_12 = arith.constant 0 : index
    %c0_13 = arith.constant 0 : index
    %c0_14 = arith.constant 0 : index
    %24 = vector.load %arg6[%c0_11, %c0_12, %c0_13, %c0_14] : memref<1x8x8x128xbf16, #tpu.memory_space<vmem>>, vector<1x8x8x128xbf16>
    %25 = vector.shape_cast %24 : vector<1x8x8x128xbf16> to vector<8x8x128xbf16>
    %26 = vector.shape_cast %23 : vector<8x8x128xbf16> to vector<1x8x8x128xbf16>
    tpu.vector_store %arg6[%c0_11, %c0_12, %c0_13, %c0_14], %26 {strides = array<i32>} : memref<1x8x8x128xbf16, #tpu.memory_space<vmem>>, vector<1x8x8x128xbf16>,
    return
  }
  func.func @transform_0(%arg0: i32, %arg1: i32) -> (i32, i32, i32, i32) {
    %c0_i32 = arith.constant 0 : i32
    %c0_i32_0 = arith.constant 0 : i32
    %c0_i32_1 = arith.constant 0 : i32
    return %arg0, %arg1, %c0_i32, %c0_i32_0 : i32, i32, i32, i32
  }
  func.func @transform_1(%arg0: i32, %arg1: i32) -> (i32, i32) {
    %c0_i32 = arith.constant 0 : i32
    %c0_i32_0 = arith.constant 0 : i32
    %c0_i32_1 = arith.constant 0 : i32
    return %c0_i32, %c0_i32_0 : i32, i32
  }
  func.func @transform_2(%arg0: i32, %arg1: i32) -> (i32, i32) {
    %c0_i32 = arith.constant 0 : i32
    %c0_i32_0 = arith.constant 0 : i32
    %c0_i32_1 = arith.constant 0 : i32
    return %c0_i32, %c0_i32_0 : i32, i32
  }
  func.func @transform_3(%arg0: i32, %arg1: i32) -> (i32, i32) {
    %c0_i32 = arith.constant 0 : i32
    %c0_i32_0 = arith.constant 0 : i32
    %c0_i32_1 = arith.constant 0 : i32
    return %c0_i32, %c0_i32_0 : i32, i32
  }
  func.func @transform_4(%arg0: i32, %arg1: i32) -> (i32, i32, i32, i32) {
    %c0_i32 = arith.constant 0 : i32
    %c0_i32_0 = arith.constant 0 : i32
    %c0_i32_1 = arith.constant 0 : i32
    return %arg0, %arg1, %c0_i32, %c0_i32_0 : i32, i32, i32, i32
  }
}

</mosaic_0001>

<bundles_post_ra>
// kernel: tpu_custom_call.1
= control target key start
LH: loop header
LB: loop body
LE: loop exit
PB: predicated region body
PF: predicated region fallthrough
CT: control target
= control target key end

     0   :  { %9 = vsyncpa [#allocation3], 0  ;;  %s1646_s0 = inlined_call_operand.hbm [shape: bf16[2,16,8,256], index: 0, kind: input, shape index: {}]   ;;  %s1647_s1 = inlined_call_operand.hbm [shape: bf16[1,256], index: 1, kind: input, shape index: {}]   ;;  %s1648_s2 = inlined_call_operand.hbm [shape: bf16[1,256], index: 2, kind: input, shape index: {}]   ;;  %s1649_s3 = inlined_call_operand.hbm [shape: bf16[128,128], index: 3, kind: input, shape index: {}]   ;;  %s1650_s4 = inlined_call_operand.hbm [shape: bf16[2,8,8,128], index: 4, kind: output, shape index: {}]  }
   0x1   :  { %11 = vsyncpa [#allocation3 + $0x1], 0 }
   0x2   :  { %12 = vsyncpa [#allocation6], 0 }
   0x3   :  { %13 = vsyncpa [#allocation9], 0 }
   0x4   :  { %14 = vsyncpa [#allocation4], 0 }
   0x5   :  { %16 = vsyncpa [#allocation4 + $0x1], 0  ;;  %s1298_s15 = smov 0   ;;  %s1300_s16 = smov 0  }
   0x6   :  { %s1302_s17 = smov 0   ;;  %s1304_s18 = smov 0  }
   0x7   :  { %s1306_s19 = smov 0   ;;  %s1308_s20 = smov 0  }
   0x8 LB: > { %s827_s21 = sadd.s32 4294967295, %s1258_s20   ;;  %s828_s22 = sadd.s32 4294967294, %s1258_s20   ;;  %s1258_s20 = sphi %s1308_s20, %s22_s20   ;;  %s1254_s19 = sphi %s1306_s19, %s1674_s19   ;;  %s1250_s18 = sphi %s1304_s18, %s1673_s18   ;;  %s1246_s17 = sphi %s1302_s17, %s1672_s17   ;;  %s1242_s16 = sphi %s1300_s16, %s1671_s16   ;;  %s1238_s15 = sphi %s1298_s15, %s1670_s15  }
   0x9   : > { %p56_p0 = scmp.ne.s32.totalorder %s1242_s16, %s1238_s15  ;;  %p1332_p1 = scmp.eq.s32.totalorder %s827_s21, 0 }
   0xa   : > { %p1336_p2 = scmp.eq.s32.totalorder %s827_s21, 1  ;;  %p151_p3 = scmp.eq.s32.totalorder %s828_s22, 1 }
   0xb   : > { %s1655_s23 = scalar_select %p1332_p1, 1, 0 }
   0xc   : > { %s1656_s24 = scalar_select %p1336_p2, 1, 0 }
   0xd   : > { %p1342_p4 = por %p1332_p1, %p56_p0  ;;  %p829_p5 = scmp.ge.s32.totalorder %s1258_s20, 1 }
   0xe   : > { %p1347_p6 = por %p151_p3, %p56_p0  ;;  %p158_p7 = scmp.lt.s32.totalorder %s1258_s20, 3 }
   0xf   : > { %s1657_s25 = scalar_select %p1342_p4, 1, 0 }
  0x10   : > { %s1658_s26 = scalar_select %p1347_p6, 1, 0 }
  0x11   : > { %p1352_p8 = pnand %p829_p5, %p158_p7  ;;  %s1260_s28 = smov [#allocation5]  }
  0x12   : > { %s171_s29 = sshll.u32 %s1260_s28, 4  ;;  %s1261_s30 = smov [#allocation7]   ;;  %s172_s29 = int_to_ptr.vmem [resolvable:$true] %s171_s29 }
  0x13   : > { %s1659_s27 = scalar_select %p1352_p8, 1, 0 }
  0x14   : > { %p961_p10 = pneg %p1352_p8  ;;  %s182_s5 = sshll.u32 %s1261_s30, 4  ;;  %s1365_s5 = int_to_ptr.vmem [resolvable:$true] %s182_s5 }
  0x15   : > { %s1262_s7 = smov [#allocation8]   ;;  %s1054_s11 = scalar_lea.hbm %s1647_s1, 32 }
  0x16   : > { %p1361_p11 = pnand %p961_p10, %p1332_p1  ;;  %s192_s8 = sshll.u32 %s1262_s7, 4  ;;  %s1367_s8 = int_to_ptr.vmem [resolvable:$true] %s192_s8 }
  0x17   : > { %p1055_p12 = scmp.ne.s32.totalorder %s1647_s1, %s1054_s11  ;;  %p1061_p5 = scmp.lt.u32.totalorder %s1054_s11, %s1647_s1 }
  0x18   : > { %p1377_p13 = pneg %p1361_p11 }
  0x1a   : > { %p1057_p0 = pnand %p1377_p13, %p1055_p12 }
  0x1c   : > { %p1058_p3 = pneg %p1057_p0 }
  0x1e   : > { %p1063_p7 = pnand %p1061_p5, %p1058_p3 }
  0x20   : > { %1066 = shalt.err (!%p1063_p7)
}
  0x21   : > { %s1067_s28 = scalar_lea.vmem %s172_s29, 32  ;;  %p1075_p1 = scmp.lt.s32.totalorder %s172_s29, %s172_s29 }
  0x22   : > { %p1068_p10 = scmp.ne.s32.totalorder %s172_s29, %s1067_s28  ;;  %p1076_p4 = scmp.lt.s32.totalorder %s1067_s28, %s1067_s28 }
  0x24   : > { %p1070_p9 = pnand %p1068_p10, %p1377_p13  ;;  %p1077_p8 = por %p1076_p4, %p1075_p1 }
  0x26   : > { %p1071_p6 = pneg %p1070_p9 }
  0x28   : > { %p1078_p2 = pnand %p1077_p8, %p1071_p6 }
  0x2a   : > { %1081 = shalt.err (!%p1078_p2)
}
  0x2b   : > { %964 = dma.hbm_to_vmem [thread:$0]  (!%p1361_p11), %s1647_s1, 32, %s172_s29, [#allocation6]  }
  0x2c   : > { %s1082_s11 = scalar_lea.hbm %s1648_s2, 32 }
  0x2d   : > { %p1083_p9 = scmp.ne.s32.totalorder %s1648_s2, %s1082_s11  ;;  %p1089_p2 = scmp.lt.u32.totalorder %s1082_s11, %s1648_s2 }
  0x2f   : > { %p1085_p12 = pnand %p1083_p9, %p1377_p13 }
  0x31   : > { %p1086_p1 = pneg %p1085_p12 }
  0x33   : > { %p1091_p4 = pnand %p1089_p2, %p1086_p1 }
  0x35   : > { %1094 = shalt.err (!%p1091_p4)
}
  0x36   : > { %s1095_s29 = scalar_lea.vmem %s1365_s5, 32  ;;  %p1103_p3 = scmp.lt.s32.totalorder %s1365_s5, %s1365_s5 }
  0x37   : > { %p1096_p6 = scmp.ne.s32.totalorder %s1365_s5, %s1095_s29  ;;  %p1104_p5 = scmp.lt.s32.totalorder %s1095_s29, %s1095_s29 }
  0x39   : > { %p1098_p8 = pnand %p1096_p6, %p1377_p13  ;;  %p1105_p7 = por %p1104_p5, %p1103_p3 }
  0x3b   : > { %p1099_p0 = pneg %p1098_p8 }
  0x3d   : > { %p1106_p10 = pnand %p1105_p7, %p1099_p0 }
  0x3f   : > { %1109 = shalt.err (!%p1106_p10)
}
  0x40   : > { %967 = dma.hbm_to_vmem [thread:$0]  (!%p1361_p11), %s1648_s2, 32, %s1365_s5, [#allocation6]  }
  0x41   : > { %s1110_s10 = scalar_lea.hbm %s1649_s3, 1024 }
  0x42   : > { %p1111_p9 = scmp.ne.s32.totalorder %s1649_s3, %s1110_s10  ;;  %p1117_p2 = scmp.lt.u32.totalorder %s1110_s10, %s1649_s3 }
  0x44   : > { %p1113_p12 = pnand %p1111_p9, %p1377_p13 }
  0x46   : > { %p1114_p1 = pneg %p1113_p12 }
  0x48   : > { %p1119_p4 = pnand %p1117_p2, %p1114_p1 }
  0x4a   : > { %1122 = shalt.err (!%p1119_p4)
}
  0x4b   : > { %s1123_s5 = scalar_lea.vmem %s1367_s8, 1024  ;;  %p1131_p3 = scmp.lt.s32.totalorder %s1367_s8, %s1367_s8 }
  0x4c   : > { %p1124_p6 = scmp.ne.s32.totalorder %s1367_s8, %s1123_s5  ;;  %p1132_p5 = scmp.lt.s32.totalorder %s1123_s5, %s1123_s5 }
  0x4e   : > { %p1126_p8 = pnand %p1124_p6, %p1377_p13  ;;  %p1133_p7 = por %p1132_p5, %p1131_p3 }
  0x50   : > { %p1127_p0 = pneg %p1126_p8 }
  0x52   : > { %p1134_p10 = pnand %p1133_p7, %p1127_p0 }
  0x54   : > { %1137 = shalt.err (!%p1134_p10)
}
  0x55   : > { %s1263_s22 = smov 64   ;;  %s1264_s14 = smov 4  }
  0x56   : > { %970 = dma.hbm_to_vmem [thread:$0]  (!%p1361_p11), %s1649_s3, 1024, %s1367_s8, [#allocation9], %s1263_s22, %s1263_s22, %s1264_s14  }
  0x57   : > { %s43_s30 = sadd.s32 1, %s1246_s17  ;;  %s34_s7 = sadd.s32 1, %s1254_s19 }
  0x58   : > { %p50_p13 = scmp.ne.s32.totalorder %s1246_s17, %s1242_s16  ;;  %p36_p9 = scmp.ge.s32.totalorder %s34_s7, 2 }
  0x59   : > { %p51_p12 = scmp.eq.s32.totalorder %s1258_s20, 0  ;;  %p1662_p1 = scmp.ne.s32.totalorder %s1656_s24, 0 }
  0x5a   : > { %p982_p4 = scmp.lt.s32.totalorder %s1258_s20, 2  ;;  %s1676_s7 = smov (%p36_p9, %s34_s7), 0 }
  0x5b   : > { %p1446_p2 = por %p1662_p1, %p50_p13  ;;  %p52_p6 = por %p51_p12, %p50_p13 }
  0x5c   : > { %s206_s6 = sand.u32 1, %s1246_s17   ;;  %s38_s10 = ssub.s32 %s1254_s19, %s1676_s7 }
  0x5d   : > { %p41_p8 = scmp.eq.s32.totalorder %s38_s10, 0  ;;  %s834_s8 = sshll.u32 %s206_s6, 7 }
  0x5e   : > { %s864_s11 = sshll.u32 %s1254_s19, 11  ;;  %s210_s5 = scalar_lea.vmem [#allocation2], %s834_s8 }
  0x5f   : > { %s1458_s12 = scalar_select %p41_p8, %s1246_s17, %s43_s30  }
  0x60   : > { %s1463_s24 = scalar_lea.hbm %s1646_s0, %s864_s11  ;;  %s220_s22 = sshll.u32 %s210_s5, 4  ;;  %s1465_s22 = int_to_ptr.vmem [resolvable:$true] %s220_s22 }
  0x61   : > { %p1469_p11 = pnand %p982_p4, %p52_p6  ;;  %s1473_s29 = scalar_lea.sflag [#allocation3], %s206_s6 }
  0x62   : > { %s1138_s28 = scalar_lea.hbm %s1463_s24, 2048  ;;  %s1143_s8 = scalar_lea.hbm %s1646_s0, 4096 }
  0x63   : > { %p1139_p0 = scmp.ne.s32.totalorder %s1463_s24, %s1138_s28  ;;  %p1140_p3 = pneg %p1469_p11 }
  0x64   : > { %p1144_p10 = scmp.lt.u32.totalorder %s1463_s24, %s1646_s0  ;;  %p1145_p13 = scmp.lt.u32.totalorder %s1143_s8, %s1138_s28 }
  0x65   : > { %p1141_p5 = pnand %p1140_p3, %p1139_p0  ;;  %p1147_p12 = scmp.lt.u32.totalorder %s1138_s28, %s1463_s24 }
  0x66   : > { %p1146_p9 = por %p1145_p13, %p1144_p10 }
  0x67   : > { %p1142_p7 = pneg %p1141_p5 }
  0x68   : > { %p1148_p1 = por %p1147_p12, %p1146_p9 }
  0x6a   : > { %p1149_p4 = pnand %p1148_p1, %p1142_p7 }
  0x6c   : > { %1152 = shalt.err (!%p1149_p4)
}
  0x6d   : > { %s1153_s6 = scalar_lea.vmem %s1465_s22, 2048  ;;  %s1265_s21 = smov [#allocation2]  }
  0x6e   : > { %p1154_p6 = scmp.ne.s32.totalorder %s1465_s22, %s1153_s6  ;;  %s1158_s5 = sshll.u32 %s1265_s21, 4  ;;  %s1159_s5 = int_to_ptr.vmem [resolvable:$false] %s1158_s5 }
  0x6f   : > { %s1160_s30 = scalar_lea.vmem %s1159_s5, 4096  ;;  %p1161_p5 = scmp.lt.s32.totalorder %s1465_s22, %s1159_s5 }
  0x70   : > { %p1156_p8 = pnand %p1154_p6, %p1140_p3  ;;  %p1162_p10 = scmp.lt.s32.totalorder %s1160_s30, %s1153_s6 }
  0x72   : > { %p1157_p0 = pneg %p1156_p8  ;;  %p1163_p13 = por %p1162_p10, %p1161_p5 }
  0x74   : > { %p1164_p9 = pnand %p1163_p13, %p1157_p0 }
  0x76   : > { %1167 = shalt.err (!%p1164_p9)
}
  0x77   : > { %s1266_s28 = smov 128   ;;  %s1267_s10 = smov 8  }
  0x78   : > { %974 = dma.hbm_to_vmem [thread:$0]  (!%p1469_p11), %s1463_s24, 2048, %s1465_s22, %s1473_s29, %s1266_s28, %s1266_s28, %s1267_s10  }
  0x79   : > { %p1665_p3 = scmp.ne.s32.totalorder %s1659_s27, 0 }
  0x7a   : > { %s1504_s8 = sand.u32 (!%p1665_p3), 1, %s1242_s16   ;;  %p1666_p7 = scmp.ne.s32.totalorder (!%p1665_p3), %s1657_s25, 0 }
  0x7b   : > { %232 = sbr.rel (%p1665_p3) target bundleno = 417 (0x1a1), region = 36  ;;  %s838_s11 = sshll.u32 (!%p1665_p3), %s1504_s8, 7 }
  0x7c   : > { %s235_s13 = scalar_lea.sflag (!%p1665_p3), [#allocation3], %s1504_s8  ;;  %s1508_s6 = scalar_lea.vmem (!%p1665_p3), [#allocation2], %s838_s11 }
  0x82   : > { %1221 = dma.done.wait (%p1666_p7), %s235_s13, 2048  }
  0x83   : > { %1223 = vsyncadd (%p1666_p7), %s235_s13, 4294965248  ;;  %p1667_p11 = scmp.ne.s32.totalorder %s1655_s23, 0 }
  0x85   : > { %1225 = dma.done.wait (%p1667_p11), [#allocation6], 64  }
  0x86   : > { %1227 = vsyncadd (%p1667_p11), [#allocation6], 4294967232 }
  0x87   : > { %1229 = dma.done.wait (%p1667_p11), [#allocation9], 1024  }
  0x88   : > { %1231 = vsyncadd (%p1667_p11), [#allocation9], 4294966272  ;;  %v1268_v0 = vmov 1966171168   ;;  %v308_v2 = vlaneseq  ;;  %v1046_v3 = vld [vmem:[#allocation8] sm:$0xff]   ;;  %v1047_v4 = vld [vmem:[#allocation8 + $0x8] sm:$0xff]  }
  0x89   : > { %v306_v1 = vunpack.c.l.s4 %v1268_v0  ;;  %905 = vmatprep.subr.bf16.mxu0 %v1046_v3  ;;  %929 = vmatprep.subr.bf16.mxu1 %v1046_v3  ;;  %v1048_v7 = vld [vmem:[#allocation8 + $0x10] sm:$0xff]   ;;  %v1049_v9 = vld [vmem:[#allocation8 + $0x18] sm:$0xff]   ;;  %v1050_v17 = vld [vmem:[#allocation8 + $0x20] sm:$0xff]   ;;  %v1269_v55 = vmov 0   ;;  %s842_s23 = sshll.u32 %s1504_s8, 5  ;;  %s869_s24 = sshll.u32 %s1250_s18, 9 }
  0x8a   : > { %v309_v6 = vshrl.u32 %v308_v2, 7  ;;  %906 = vmatpush3.bf16.msra.mxu0 %v1046_v3  ;;  %937 = vmatpush3.bf16.msra.mxu1 %v1046_v3  ;;  %v843_v10 = vld.sshfl [vmem:[#allocation5] sm:$0x11 pattern:$0x75316420]  ;;  %v1051_v26 = vld [vmem:[#allocation8 + $0x28] sm:$0xff]   ;;  %s1597_s29 = scalar_lea.hbm %s1650_s4, %s869_s24 }
  0x8b   : > { %v307_v5 = vunpack.c.0.s8 %v306_v1  ;;  %907 = vmatprep.subr.bf16.mxu0 %v1047_v4  ;;  %930 = vmatprep.subr.bf16.mxu1 %v1047_v4  ;;  %v845_v11 = vld.sshfl [vmem:[#allocation7] sm:$0x11 pattern:$0x75316420]  ;;  %v304_v12 = vcombine.high %v843_v10, %v843_v10  ;;  %v279_v29 = vld [vmem:[%s1508_s6 + $0x8] sm:$0xff]  ;;  %v280_v30 = vld [vmem:[%s1508_s6 + $0x10] sm:$0xff] }
  0x8c   : > { %v324_v14 = vsub.s32 0, %v309_v6  ;;  %v363_v15 = vcombine.high %v845_v11, %v845_v11  ;;  %v278_v27 = vld [vmem:[%s1508_s6] sm:$0xff]  ;;  %v281_v31 = vld [vmem:[%s1508_s6 + $0x18] sm:$0xff]  ;;  %v287_v35 = vld [vmem:[%s1508_s6 + $0x48] sm:$0xff]  ;;  %s274_s25 = scalar_lea.vmem [#allocation10], %s842_s23  ;;  %s696_s18 = scalar_lea.sflag [#allocation4], %s1504_s8 }
  0x8d   : > { %v310_v8 = vsub.s32 %v307_v5, %v309_v6  ;;  %v286_v34 = vld [vmem:[%s1508_s6 + $0x40] sm:$0xff]  ;;  %v288_v36 = vld [vmem:[%s1508_s6 + $0x50] sm:$0xff]  ;;  %v289_v38 = vld [vmem:[%s1508_s6 + $0x58] sm:$0xff]  ;;  %s711_s27 = sshll.u32 %s274_s25, 4  ;;  %s1270_s5 = smov [#allocation10]   ;;  %s1592_s27 = int_to_ptr.vmem [resolvable:$true] %s711_s27 }
  0x8e   : > { %908 = vmatpush3.bf16.msra.mxu0 %v1047_v4  ;;  %938 = vmatpush3.bf16.msra.mxu1 %v1047_v4  ;;  %v1052_v39 = vld [vmem:[#allocation8 + $0x30] sm:$0xff]   ;;  %v1053_v54 = vld [vmem:[#allocation8 + $0x38] sm:$0xff]   ;;  %s1168_s21 = scalar_lea.vmem %s1592_s27, 512  ;;  %s1172_s30 = sshll.u32 %s1270_s5, 4  ;;  %s1173_s30 = int_to_ptr.vmem [resolvable:$false] %s1172_s30 }
  0x8f   : > { %909 = vmatprep.subr.bf16.mxu0 %v1048_v7  ;;  %931 = vmatprep.subr.bf16.mxu1 %v1048_v7  ;;  %v311_v13 = vrot.slane %v843_v10, %v310_v8  ;;  %v370_v16 = vrot.slane %v845_v11, %v310_v8  ;;  %v318_v18 = vrot.slane %v304_v12, %v310_v8  ;;  %p1169_p12 = scmp.ne.s32.totalorder %s1592_s27, %s1168_s21  ;;  %s1174_s28 = scalar_lea.vmem %s1173_s30, 1024 }
  0x90   : > { %v377_v20 = vrot.slane %v363_v15, %v310_v8  ;;  %v282_v15 = vld [vmem:[%s1508_s6 + $0x20] sm:$0xff]  ;;  %p1175_p6 = scmp.lt.s32.totalorder %s1592_s27, %s1173_s30  ;;  %p1176_p8 = scmp.lt.s32.totalorder %s1174_s28, %s1168_s21 }
  0x91   : > { %v320_v19 = vpack.i.b16 %v311_v13, %v311_v13  ;;  %v379_v21 = vpack.i.b16 %v370_v16, %v370_v16  ;;  %v327_v23 = vpack.i.b16 %v318_v18, %v318_v18  ;;  %v283_v16 = vld [vmem:[%s1508_s6 + $0x28] sm:$0xff]  ;;  %p1170_p1 = pnand %p1169_p12, %p1446_p2 }
  0x92   : > { %910 = vmatpush3.bf16.msra.mxu0 %v1048_v7  ;;  %939 = vmatpush3.bf16.msra.mxu1 %v1048_v7  ;;  %v386_v25 = vpack.i.b16 %v377_v20, %v377_v20  ;;  %p1177_p0 = por %p1176_p8, %p1175_p6 }
  0x93   : > { %911 = vmatprep.subr.bf16.mxu0 %v1049_v9  ;;  %932 = vmatprep.subr.bf16.mxu1 %v1049_v9  ;;  %v325_v22 = vrot.slane %v320_v19, %v324_v14  ;;  %v384_v24 = vrot.slane %v379_v21, %v324_v14  ;;  %v332_v28 = vrot.slane %v327_v23, %v324_v14  ;;  %v284_v21 = vld [vmem:[%s1508_s6 + $0x30] sm:$0xff]  ;;  %p1171_p4 = pneg %p1170_p1 }
  0x94   : > { %v391_v32 = vrot.slane %v386_v25, %v324_v14 }
  0x95   : > { %v1526_v33 = vcombine.low %v325_v22, %v332_v28  ;;  %p1178_p5 = pnand %p1177_p0, %p1171_p4 }
  0x96   : > { %912 = vmatpush3.bf16.msra.mxu0 %v1049_v9  ;;  %940 = vmatpush3.bf16.msra.mxu1 %v1049_v9  ;;  %v1531_v37 = vcombine.low %v384_v24, %v391_v32 }
  0x97   : > { %913 = vmatprep.subr.bf16.mxu0 %v1050_v17  ;;  %933 = vmatprep.subr.bf16.mxu1 %v1050_v17  ;;  %v339_v40 = vmul.bf16 %v1526_v33, %v278_v27  ;;  %v340_v41 = vmul.bf16 %v1526_v33, %v279_v29  ;;  %v341_v42 = vmul.bf16 %v1526_v33, %v280_v30 }
  0x98   : > { %v342_v43 = vmul.bf16 %v1526_v33, %v281_v31  ;;  %v347_v44 = vmul.bf16 %v1526_v33, %v286_v34  ;;  %v348_v45 = vmul.bf16 %v1526_v33, %v287_v35  ;;  %v349_v46 = vmul.bf16 %v1526_v33, %v288_v36  ;;  %v290_v31 = vld [vmem:[%s1508_s6 + $0x60] sm:$0xff] }
  0x99   : > { %v398_v47 = vadd.bf16 %v1531_v37, %v339_v40  ;;  %v399_v48 = vadd.bf16 %v1531_v37, %v340_v41  ;;  %v400_v49 = vadd.bf16 %v1531_v37, %v341_v42  ;;  %v350_v50 = vmul.bf16 %v1526_v33, %v289_v38  ;;  %v291_v38 = vld [vmem:[%s1508_s6 + $0x68] sm:$0xff] }
  0x9a   : > { %914 = vmatpush3.bf16.msra.mxu0 %v1050_v17  ;;  %941 = vmatpush3.bf16.msra.mxu1 %v1050_v17  ;;  %v401_v51 = vadd.bf16 %v1531_v37, %v342_v43  ;;  %v406_v52 = vadd.bf16 %v1531_v37, %v347_v44  ;;  %v407_v53 = vadd.bf16 %v1531_v37, %v348_v45  ;;  %v292_v43 = vld [vmem:[%s1508_s6 + $0x70] sm:$0xff]  ;;  %v293_v44 = vld [vmem:[%s1508_s6 + $0x78] sm:$0xff] }
  0x9b   : > { %915 = vmatprep.subr.bf16.mxu0 %v1051_v26  ;;  %934 = vmatprep.subr.bf16.mxu1 %v1051_v26  ;;  %v414_v56 = vmax.bf16 %v1269_v55, %v398_v47  ;;  %v415_v57 = vmax.bf16 %v1269_v55, %v399_v48  ;;  %v416_v58 = vmax.bf16 %v1269_v55, %v400_v49 }
  0x9c   : > { %v417_v59 = vmax.bf16 %v1269_v55, %v401_v51  ;;  %v408_v60 = vadd.bf16 %v1531_v37, %v349_v46  ;;  %v409_v61 = vadd.bf16 %v1531_v37, %v350_v50  ;;  %v422_v62 = vmax.bf16 %v1269_v55, %v406_v52 }
  0x9d   : > { %v446_v63 = vrot.slane %v414_v56, 4  ;;  %v447_v0 = vrot.slane %v415_v57, 4  ;;  %v448_v1 = vrot.slane %v416_v58, 4  ;;  %v423_v2 = vmax.bf16 %v1269_v55, %v407_v53 }
  0x9e   : > { %916 = vmatpush3.bf16.msra.mxu0 %v1051_v26  ;;  %942 = vmatpush3.bf16.msra.mxu1 %v1051_v26  ;;  %v449_v3 = vrot.slane %v417_v59, 4  ;;  %v424_v4 = vmax.bf16 %v1269_v55, %v408_v60  ;;  %v425_v5 = vmax.bf16 %v1269_v55, %v409_v61  ;;  %v454_v6 = vrot.slane %v422_v62, 4  ;;  %v285_v26 = vld [vmem:[%s1508_s6 + $0x38] sm:$0xff] }
  0x9f   : > { %917 = vmatprep.subr.bf16.mxu0 %v1052_v39  ;;  %935 = vmatprep.subr.bf16.mxu1 %v1052_v39  ;;  %v478_v7 = vadd.bf16 %v446_v63, %v414_v56  ;;  %v479_v8 = vadd.bf16 %v447_v0, %v415_v57  ;;  %v480_v9 = vadd.bf16 %v448_v1, %v416_v58  ;;  %v455_v10 = vrot.slane %v423_v2, 4 }
  0xa0   : > { %v481_v11 = vadd.bf16 %v449_v3, %v417_v59  ;;  %v456_v12 = vrot.slane %v424_v4, 4  ;;  %v457_v13 = vrot.slane %v425_v5, 4  ;;  %v486_v14 = vadd.bf16 %v454_v6, %v422_v62 }
  0xa1   : > { %v494_v17 = vunpack.c.l.bf16 %v478_v7  ;;  %v495_v18 = vunpack.c.l.bf16 %v479_v8  ;;  %v496_v19 = vunpack.c.l.bf16 %v480_v9  ;;  %v487_v20 = vadd.bf16 %v455_v10, %v423_v2 }
  0xa2   : > { %918 = vmatpush3.bf16.msra.mxu0 %v1052_v39  ;;  %943 = vmatpush3.bf16.msra.mxu1 %v1052_v39  ;;  %v497_v22 = vunpack.c.l.bf16 %v481_v11  ;;  %v488_v23 = vadd.bf16 %v456_v12, %v424_v4  ;;  %v489_v24 = vadd.bf16 %v457_v13, %v425_v5  ;;  %v502_v25 = vunpack.c.l.bf16 %v486_v14 }
  0xa3   : > { %919 = vmatprep.subr.bf16.mxu0 %v1053_v54  ;;  %936 = vmatprep.subr.bf16.mxu1 %v1053_v54  ;;  %v510_v27 = vadd.f32 %v495_v18, %v494_v17  ;;  %v503_v28 = vunpack.c.l.bf16 %v487_v20  ;;  %v343_v29 = vmul.bf16 %v1526_v33, %v282_v15  ;;  %v344_v30 = vmul.bf16 %v1526_v33, %v283_v16 }
  0xa4   : > { %v511_v32 = vadd.f32 %v497_v22, %v496_v19  ;;  %v504_v34 = vunpack.c.l.bf16 %v488_v23  ;;  %v505_v35 = vunpack.c.l.bf16 %v489_v24  ;;  %v345_v36 = vmul.bf16 %v1526_v33, %v284_v21 }
  0xa5   : > { %v514_v39 = vadd.f32 %v503_v28, %v502_v25  ;;  %v346_v40 = vmul.bf16 %v1526_v33, %v285_v26  ;;  %v402_v41 = vadd.bf16 %v1531_v37, %v343_v29  ;;  %v403_v42 = vadd.bf16 %v1531_v37, %v344_v30 }
  0xa6   : > { %920 = vmatpush3.bf16.msra.mxu0 %v1053_v54  ;;  %944 = vmatpush3.bf16.msra.mxu1 %v1053_v54  ;;  %v865_v45 = vpack.c.bf16 %v511_v32, %v510_v27  ;;  %v515_v46 = vadd.f32 %v505_v35, %v504_v34  ;;  %v404_v47 = vadd.bf16 %v1531_v37, %v345_v36 }
  0xa7   : > { %v351_v48 = vmul.bf16 %v1526_v33, %v290_v31  ;;  %v405_v49 = vadd.bf16 %v1531_v37, %v346_v40  ;;  %v418_v50 = vmax.bf16 %v1269_v55, %v402_v41  ;;  %v419_v51 = vmax.bf16 %v1269_v55, %v403_v42 }
  0xa8   : > { %v352_v52 = vmul.bf16 %v1526_v33, %v291_v38  ;;  %921 = vmatprep.mubr.bf16.mxu0 %v865_v45  ;;  %v867_v53 = vpack.c.bf16 %v515_v46, %v514_v39  ;;  %v420_v54 = vmax.bf16 %v1269_v55, %v404_v47  ;;  %v353_v56 = vmul.bf16 %v1526_v33, %v292_v43 }
  0xa9   : > { %v354_v57 = vmul.bf16 %v1526_v33, %v293_v44  ;;  %v421_v58 = vmax.bf16 %v1269_v55, %v405_v49  ;;  %v450_v59 = vrot.slane %v418_v50, 4  ;;  %v451_v60 = vrot.slane %v419_v51, 4 }
  0xaa   : > { %v410_v61 = vadd.bf16 %v1531_v37, %v351_v48  ;;  %925 = vmatprep.mubr.bf16.mxu1 %v867_v53  ;;  %v452_v62 = vrot.slane %v420_v54, 4  ;;  %v411_v63 = vadd.bf16 %v1531_v37, %v352_v52  ;;  %v412_v0 = vadd.bf16 %v1531_v37, %v353_v56 }
  0xab   : > { %v413_v1 = vadd.bf16 %v1531_v37, %v354_v57  ;;  %v453_v2 = vrot.slane %v421_v58, 4  ;;  %v482_v3 = vadd.bf16 %v450_v59, %v418_v50  ;;  %v483_v4 = vadd.bf16 %v451_v60, %v419_v51 }
  0xac   : > { %v426_v5 = vmax.bf16 %v1269_v55, %v410_v61  ;;  %v484_v33 = vadd.bf16 %v452_v62, %v420_v54  ;;  %v427_v6 = vmax.bf16 %v1269_v55, %v411_v63  ;;  %v428_v7 = vmax.bf16 %v1269_v55, %v412_v0 }
  0xad   : > { %v429_v8 = vmax.bf16 %v1269_v55, %v413_v1  ;;  %v485_v9 = vadd.bf16 %v453_v2, %v421_v58  ;;  %v498_v10 = vunpack.c.l.bf16 %v482_v3  ;;  %v499_v11 = vunpack.c.l.bf16 %v483_v4 }
  0xae   : > { %v458_v12 = vrot.slane %v426_v5, 4  ;;  %v500_v13 = vunpack.c.l.bf16 %v484_v33  ;;  %v459_v14 = vrot.slane %v427_v6, 4  ;;  %v460_v15 = vrot.slane %v428_v7, 4 }
  0xaf   : > { %v461_v37 = vrot.slane %v429_v8, 4  ;;  %v501_v16 = vunpack.c.l.bf16 %v485_v9  ;;  %v512_v17 = vadd.f32 %v499_v11, %v498_v10 }
  0xb0   : > { %v490_v18 = vadd.bf16 %v458_v12, %v426_v5  ;;  %v491_v19 = vadd.bf16 %v459_v14, %v427_v6  ;;  %v492_v20 = vadd.bf16 %v460_v15, %v428_v7 }
  0xb1   : > { %v493_v21 = vadd.bf16 %v461_v37, %v429_v8  ;;  %v513_v22 = vadd.f32 %v501_v16, %v500_v13 }
  0xb2   : > { %v506_v23 = vunpack.c.l.bf16 %v490_v18  ;;  %v507_v24 = vunpack.c.l.bf16 %v491_v19  ;;  %v508_v25 = vunpack.c.l.bf16 %v492_v20 }
  0xb3   : > { %v509_v55 = vunpack.c.l.bf16 %v493_v21  ;;  %v866_v26 = vpack.c.bf16 %v513_v22, %v512_v17 }
  0xb4   : > { %v516_v27 = vadd.f32 %v507_v24, %v506_v23 }
  0xb5   : > { %v517_v28 = vadd.f32 %v509_v55, %v508_v25  ;;  %922 = vmatmul.mubr.bf16.vlgmr.msra.gmra.mrb[0].mxu0 %v866_v26 }
  0xb7   : > { %v868_v29 = vpack.c.bf16 %v517_v28, %v516_v27 }
  0xb9   : > { %926 = vmatmul.mubr.bf16.vlgmr.msra.gmra.mrb[0].mxu1 %v868_v29 }
 0x188   : > { %v923_v30 = vpop.f32.mrb[0].mxu0 }
 0x189   : > { %v648_v31 = vpop.f32.mrb[1].mxu0 }
 0x18a   : > { %v924_v32 = vpop.f32.mrb[2].mxu0 }
 0x18b   : > { %v878_v35 = vpack.c.bf16 %v924_v32, %v923_v30  ;;  %v651_v36 = vpop.f32.mrb[3].mxu0 }
 0x18c   : > { %v927_v34 = vpop.f32.mrb[0].mxu1  ;;  %v873_v39 = vpack.c.bf16 %v651_v36, %v648_v31 }
 0x18d   : > { %v664_v38 = vpop.f32.mrb[1].mxu1  ;;  %890 = vst [vmem:[%s274_s25 + $0x8] sm:$0xff] %v878_v35  }
 0x18e   : > { %v928_v40 = vpop.f32.mrb[2].mxu1  ;;  %874 = vst [vmem:[%s274_s25] sm:$0xff] %v873_v39  }
 0x18f   : > { %v888_v41 = vpack.c.bf16 %v928_v40, %v927_v34  ;;  %v667_v42 = vpop.f32.mrb[3].mxu1 }
 0x190   : > { %v883_v43 = vpack.c.bf16 %v667_v42, %v664_v38 }
 0x191   : > { %892 = vst [vmem:[%s274_s25 + $0x18] sm:$0xff] %v888_v41  }
 0x192   : > { %891 = vst [vmem:[%s274_s25 + $0x10] sm:$0xff] %v883_v43  }
 0x193   : > { %1181 = shalt.err (!%p1178_p5)
}
 0x194   : > { %s1182_s10 = scalar_lea.hbm %s1597_s29, 512  ;;  %s1186_s6 = scalar_lea.hbm %s1650_s4, 1024 }
 0x195   : > { %p1183_p10 = scmp.ne.s32.totalorder %s1597_s29, %s1182_s10  ;;  %p1187_p3 = scmp.lt.u32.totalorder %s1597_s29, %s1650_s4 }
 0x196   : > { %p1188_p7 = scmp.lt.u32.totalorder %s1186_s6, %s1182_s10  ;;  %p1190_p12 = scmp.lt.u32.totalorder %s1182_s10, %s1597_s29 }
 0x197   : > { %p1184_p13 = pnand %p1183_p10, %p1446_p2 }
 0x198   : > { %p1189_p11 = por %p1188_p7, %p1187_p3 }
 0x199   : > { %p1185_p9 = pneg %p1184_p13 }
 0x19a   : > { %p1191_p1 = por %p1190_p12, %p1189_p11 }
 0x19c   : > { %p1192_p4 = pnand %p1191_p1, %p1185_p9 }
 0x19e   : > { %1195 = shalt.err (!%p1192_p4)
}
 0x19f   : > { %s1271_s24 = smov 64   ;;  %s1272_s22 = smov 4  }
 0x1a0   : > { %959 = dma.vmem_to_hbm [thread:$0]  (%p1446_p2), %s1592_s27, 512, %s1597_s29, %s696_s18, %s1271_s24, %s1271_s24, %s1272_s22  }
 0x1a1 PF: > { %s726_s14 = sand.u32 1, %s1238_s15   ;;  %p1668_p6 = scmp.ne.s32.totalorder %s1658_s26, 0 }
 0x1a2   : > { %p1669_p8 = scmp.ge.s32.totalorder %s1258_s20, 2  ;;  %s727_s21 = scalar_lea.sflag [#allocation4], %s726_s14 }
 0x1a4   : > { %p976_p0 = pnand %p1669_p8, %p1668_p6 }
 0x1a6   : > { %1233 = dma.done.wait (!%p976_p0), %s727_s21, 512  }
 0x1a7   : > { %1235 = vsyncadd (!%p976_p0), %s727_s21, 4294966784  ;;  %s22_s20 = sadd.s32 1, %s1258_s20   ;;  %s1670_s15 = smov %s1242_s16 }
 0x1a8   : > { %p19_p5 = scmp.ge.s32.totalorder %s22_s20, 4   ;;  %s1671_s16 = smov %s1246_s17 }
 0x1a9   : > { %s1672_s17 = smov %s1458_s12  ;;  %s1673_s18 = smov %s1254_s19 }
 0x1aa   : > { %s1674_s19 = smov %s1676_s7  ;;  %21 = sbr.rel (!%p19_p5) target bundleno = 8 (0x8), region = 93 }
 0x1b1   :  { %732 = vsyncpa [#allocation3], 1 }
 0x1b2   :  { %734 = vsyncpa [#allocation3 + $0x1], 1 }
 0x1b3   :  { %735 = vsyncpa [#allocation6], 1 }
 0x1b4   :  { %736 = vsyncpa [#allocation9], 1 }
 0x1b5   :  { %737 = vsyncpa [#allocation4], 1 }
 0x1b6   :  { %739 = vsyncpa [#allocation4 + $0x1], 1 }

</bundles_post_ra>
